<compile_context>
chip_gen: v7x
topology: tpu7x:2x2x1
jax: 0.10.0
libtpu: 0.0.40
codegen_flags: <defaults>
</compile_context>

<pallas_src>
import functools

import jax
import jax.numpy as jnp
from jax.experimental import pallas as pl
from jax.experimental.pallas import tpu as pltpu

OBS_PAD = 128      # obs features zero-padded to one full lane group
HID = 256          # shared trunk width
HEAD = 128         # per-head hidden width (policy + value fused -> 2*HEAD = 256)
OUT_LANES = 128    # lane-dense fused output slab width


def _policy_net_kernel(
    x_ref,                     # (TB, OBS_PAD) bf16
    w1_ref, b1_ref,            # (OBS_PAD, HID) bf16, (1, HID) f32
    w2_ref, b2_ref,            # (HID, HID)     bf16, (1, HID) f32
    wh1_ref, bh1_ref,          # fused head-1:  (HID, 2*HEAD) bf16, (1, 2*HEAD) f32
    wh2_ref, bh2_ref,          # fused head-2 (block-diag): (2*HEAD, OUT_LANES) bf16, (1, OUT_LANES) f32
    out_ref,                   # (TB, OUT_LANES) f32 slab
    *, act_dim,
):
    x = x_ref[...]

    # shared trunk (bf16 MXU inputs, f32 accumulation, f32 elementwise)
    h = jnp.dot(x, w1_ref[...], preferred_element_type=jnp.float32) + b1_ref[...]
    h = jnp.maximum(h, 0.0)
    h = jnp.dot(h.astype(jnp.bfloat16), w2_ref[...],
                preferred_element_type=jnp.float32) + b2_ref[...]
    h = jnp.maximum(h, 0.0)

    # fused head hidden: lanes [0,HEAD) = policy hidden, [HEAD,2*HEAD) = value hidden
    g = jnp.dot(h.astype(jnp.bfloat16), wh1_ref[...],
                preferred_element_type=jnp.float32) + bh1_ref[...]
    g = jnp.maximum(g, 0.0)

    # fused head output via block-diagonal weight -> lane-dense (TB, OUT_LANES) slab:
    #   lanes [0, act_dim) = policy pre-activation, lane act_dim = value (linear)
    o = jnp.dot(g.astype(jnp.bfloat16), wh2_ref[...],
                preferred_element_type=jnp.float32) + bh2_ref[...]
    lane = jax.lax.broadcasted_iota(jnp.int32, o.shape, dimension=1)
    out_ref[...] = jnp.where(lane < act_dim, jnp.tanh(o), o)


def pack_params(params, obs_dim, act_dim):
    """Build the fused / padded / bf16 kernel parameters ONCE (not per call)."""
    assert act_dim + 1 <= OUT_LANES

    # pad obs_dim rows of w1 up to 128 (matches zero-padded x columns)
    w1 = jnp.zeros((OBS_PAD, HID), jnp.float32).at[:obs_dim, :].set(params["w1"])

    # fused head-1: [wp1 | wv1] along N
    wh1 = jnp.concatenate([params["wp1"], params["wv1"]], axis=1)      # (256, 256)
    bh1 = jnp.concatenate([params["bp1"], params["bv1"]], axis=1)      # (1, 256)

    # fused head-2: block-diagonal into a lane-dense 128-wide output slab
    wh2 = jnp.zeros((2 * HEAD, OUT_LANES), jnp.float32)
    wh2 = wh2.at[:HEAD, :act_dim].set(params["wp2"])                   # policy block
    wh2 = wh2.at[HEAD:, act_dim:act_dim + 1].set(params["wv2"])        # value block
    bh2 = jnp.zeros((1, OUT_LANES), jnp.float32)
    bh2 = bh2.at[:, :act_dim].set(params["bp2"])
    bh2 = bh2.at[:, act_dim:act_dim + 1].set(params["bv2"])

    return {
        "w1": w1.astype(jnp.bfloat16), "b1": params["b1"],
        "w2": params["w2"].astype(jnp.bfloat16), "b2": params["b2"],
        "wh1": wh1.astype(jnp.bfloat16), "bh1": bh1,
        "wh2": wh2.astype(jnp.bfloat16), "bh2": bh2,
    }


@functools.partial(jax.jit, static_argnames=("obs_dim", "act_dim"))
def policy_network_forward(x, packed, obs_dim, act_dim):
    """Full PolicyNetwork forward pass inside a single Pallas kernel."""
    B = x.shape[0]

    # batch tile: multiple of 8 sublanes; large batches get pipelined 512-row tiles
    # (fits comfortably under v7x's 32 MiB default scoped VMEM with resident weights)
    TB = 512 if B >= 512 else max(8, ((B + 7) // 8) * 8)
    B_pad = ((B + TB - 1) // TB) * TB

    x_pad = jnp.zeros((B_pad, OBS_PAD), jnp.bfloat16)
    x_pad = x_pad.at[:B, :obs_dim].set(x.astype(jnp.bfloat16))

    flat = (
        x_pad,
        packed["w1"], packed["b1"],
        packed["w2"], packed["b2"],
        packed["wh1"], packed["bh1"],
        packed["wh2"], packed["bh2"],
    )

    def resident(a):
        # weights / biases: full-array block, same block every grid step (stay in VMEM)
        return pl.BlockSpec(a.shape, lambda i: (0,) * a.ndim)

    in_specs = [pl.BlockSpec((TB, OBS_PAD), lambda i: (i, 0))]
    in_specs += [resident(a) for a in flat[1:]]
    out_spec = pl.BlockSpec((TB, OUT_LANES), lambda i: (i, 0))

    flops = 2 * B_pad * (OBS_PAD * HID + HID * HID + HID * (2 * HEAD)
                         + (2 * HEAD) * OUT_LANES)
    bytes_accessed = sum(int(a.size) * a.dtype.itemsize for a in flat) \
        + B_pad * OUT_LANES * 4
    cost = pl.CostEstimate(flops=flops,
                           transcendentals=B_pad * OUT_LANES,
                           bytes_accessed=bytes_accessed)

    out = pl.pallas_call(
        functools.partial(_policy_net_kernel, act_dim=act_dim),
        out_shape=jax.ShapeDtypeStruct((B_pad, OUT_LANES), jnp.float32),
        grid=(B_pad // TB,),
        in_specs=in_specs,
        out_specs=out_spec,
        compiler_params=pltpu.CompilerParams(dimension_semantics=("parallel",)),
        cost_estimate=cost,
    )(*flat)

    pol = out[:B, :act_dim]
    val = out[:B, act_dim:act_dim + 1]
    return pol, val


def init_params(key, obs_dim, act_dim):
    """Deterministic init mimicking nn.Linear default (U(-1/sqrt(in), 1/sqrt(in))).

    Weights stored as (in, out) so the math is y = x @ W + b.
    """
    def linear(key, fan_in, fan_out):
        kw, kb = jax.random.split(key)
        bound = 1.0 / jnp.sqrt(fan_in)
        w = jax.random.uniform(kw, (fan_in, fan_out), jnp.float32, -bound, bound)
        b = jax.random.uniform(kb, (1, fan_out), jnp.float32, -bound, bound)
        return w, b

    keys = jax.random.split(key, 6)
    w1, b1 = linear(keys[0], obs_dim, 256)
    w2, b2 = linear(keys[1], 256, 256)
    wp1, bp1 = linear(keys[2], 256, 128)
    wp2, bp2 = linear(keys[3], 128, act_dim)
    wv1, bv1 = linear(keys[4], 256, 128)
    wv2, bv2 = linear(keys[5], 128, 1)
    # self.log_std is a standalone parameter not used in forward(); kept for parity.
    log_std = jnp.zeros((act_dim,), jnp.float32)
    return {
        "w1": w1, "b1": b1, "w2": w2, "b2": b2,
        "wp1": wp1, "bp1": bp1, "wp2": wp2, "bp2": bp2,
        "wv1": wv1, "bv1": bv1, "wv2": wv2, "bv2": bv2,
        "log_std": log_std,
    }


def reference_forward(x, params):
    """Pure-JAX f32 reference (matches the PyTorch forward exactly)."""
    h = jnp.maximum(x @ params["w1"] + params["b1"], 0.0)
    h = jnp.maximum(h @ params["w2"] + params["b2"], 0.0)
    p = jnp.maximum(h @ params["wp1"] + params["bp1"], 0.0)
    p = jnp.tanh(p @ params["wp2"] + params["bp2"])
    v = jnp.maximum(h @ params["wv1"] + params["bv1"], 0.0)
    v = v @ params["wv2"] + params["bv2"]
    return p, v


if __name__ == "__main__":
    obs_dim = 16
    act_dim = 8
    batch = 8

    key = jax.random.PRNGKey(0)
    k_params, k_x = jax.random.split(key)
    params = init_params(k_params, obs_dim, act_dim)
    packed = pack_params(params, obs_dim, act_dim)
    x = jax.random.normal(k_x, (batch, obs_dim), jnp.float32)

    pol, val = policy_network_forward(x, packed, obs_dim, act_dim)
    pol = jax.block_until_ready(pol)
    val = jax.block_until_ready(val)

    pol_ref, val_ref = reference_forward(x, params)
    assert pol.shape == (batch, act_dim)
    assert val.shape == (batch, 1)
    # bf16 MXU inputs with f32 accumulation -> relaxed tolerance vs f32 reference.
    assert jnp.allclose(pol, pol_ref, atol=2e-2, rtol=2e-2)
    assert jnp.allclose(val, val_ref, atol=2e-2, rtol=2e-2)

    # TODO(synk): get_action_and_value / evaluate_actions (Normal sampling, log_prob,
    # entropy, log_std) are host-side policy utilities outside forward(); not kernelized.

    print("KERNEL_OK")
</pallas_src>

<mosaic_0001>
module attributes {stable_mosaic.version = 11 : i64} {
  func.func @_policy_net_kernel(%arg0: i32, %arg1: memref<8x128xbf16, #tpu.memory_space<vmem>>, %arg2: memref<128x256xbf16, #tpu.memory_space<vmem>>, %arg3: memref<1x256xf32, #tpu.memory_space<vmem>>, %arg4: memref<256x256xbf16, #tpu.memory_space<vmem>>, %arg5: memref<1x256xf32, #tpu.memory_space<vmem>>, %arg6: memref<256x256xbf16, #tpu.memory_space<vmem>>, %arg7: memref<1x256xf32, #tpu.memory_space<vmem>>, %arg8: memref<256x128xbf16, #tpu.memory_space<vmem>>, %arg9: memref<1x128xf32, #tpu.memory_space<vmem>>, %arg10: memref<8x128xf32, #tpu.memory_space<vmem>>) attributes {dimension_semantics = [#tpu.dimension_semantics<parallel>], iteration_bounds = array<i64: 1>, scalar_prefetch = 0 : i64, scratch_operands = 0 : i64, tpu.core_type = #tpu.core_type<tc>, window_params = [{transform_indices = @transform_0, window_bounds = array<i64: 8, 128>}, {pipeline_mode = #tpu.pipeline_mode<synchronous>, transform_indices = @transform_1, window_bounds = array<i64: 128, 256>}, {pipeline_mode = #tpu.pipeline_mode<synchronous>, transform_indices = @transform_2, window_bounds = array<i64: 1, 256>}, {pipeline_mode = #tpu.pipeline_mode<synchronous>, transform_indices = @transform_3, window_bounds = array<i64: 256, 256>}, {pipeline_mode = #tpu.pipeline_mode<synchronous>, transform_indices = @transform_4, window_bounds = array<i64: 1, 256>}, {pipeline_mode = #tpu.pipeline_mode<synchronous>, transform_indices = @transform_5, window_bounds = array<i64: 256, 256>}, {pipeline_mode = #tpu.pipeline_mode<synchronous>, transform_indices = @transform_6, window_bounds = array<i64: 1, 256>}, {pipeline_mode = #tpu.pipeline_mode<synchronous>, transform_indices = @transform_7, window_bounds = array<i64: 256, 128>}, {pipeline_mode = #tpu.pipeline_mode<synchronous>, transform_indices = @transform_8, window_bounds = array<i64: 1, 128>}, {transform_indices = @transform_9, window_bounds = array<i64: 8, 128>}]} {
    %c0 = arith.constant 0 : index
    %c0_0 = arith.constant 0 : index
    %0 = vector.load %arg1[%c0, %c0_0] : memref<8x128xbf16, #tpu.memory_space<vmem>>, vector<8x128xbf16>
    %c0_1 = arith.constant 0 : index
    %c0_2 = arith.constant 0 : index
    %1 = vector.load %arg2[%c0_1, %c0_2] : memref<128x256xbf16, #tpu.memory_space<vmem>>, vector<128x256xbf16>
    %cst = arith.constant dense<0.000000e+00> : vector<8x256xf32>
    %2 = tpu.matmul %0, %1, %cst {dimension_numbers = #tpu.dot_dimension_numbers<[1], [0], [0], [1], [0, 0, 1, 1], [], []>} : vector<8x128xbf16>, vector<128x256xbf16>, vector<8x256xf32> -> vector<8x256xf32>
    %c0_3 = arith.constant 0 : index
    %c0_4 = arith.constant 0 : index
    %3 = vector.load %arg3[%c0_3, %c0_4] : memref<1x256xf32, #tpu.memory_space<vmem>>, vector<1x256xf32>
    %4 = vector.broadcast %3 : vector<1x256xf32> to vector<8x256xf32>
    %5 = arith.addf %2, %4 : vector<8x256xf32>
    %cst_5 = arith.constant 0.000000e+00 : f32
    %6 = vector.broadcast %cst_5 : f32 to vector<8x256xf32>
    %7 = arith.maximumf %5, %6 : vector<8x256xf32>
    %8 = arith.truncf %7 : vector<8x256xf32> to vector<8x256xbf16>
    %c0_6 = arith.constant 0 : index
    %c0_7 = arith.constant 0 : index
    %9 = vector.load %arg4[%c0_6, %c0_7] : memref<256x256xbf16, #tpu.memory_space<vmem>>, vector<256x256xbf16>
    %cst_8 = arith.constant dense<0.000000e+00> : vector<8x256xf32>
    %10 = tpu.matmul %8, %9, %cst_8 {dimension_numbers = #tpu.dot_dimension_numbers<[1], [0], [0], [1], [0, 0, 1, 1], [], []>} : vector<8x256xbf16>, vector<256x256xbf16>, vector<8x256xf32> -> vector<8x256xf32>
    %c0_9 = arith.constant 0 : index
    %c0_10 = arith.constant 0 : index
    %11 = vector.load %arg5[%c0_9, %c0_10] : memref<1x256xf32, #tpu.memory_space<vmem>>, vector<1x256xf32>
    %12 = vector.broadcast %11 : vector<1x256xf32> to vector<8x256xf32>
    %13 = arith.addf %10, %12 : vector<8x256xf32>
    %cst_11 = arith.constant 0.000000e+00 : f32
    %14 = vector.broadcast %cst_11 : f32 to vector<8x256xf32>
    %15 = arith.maximumf %13, %14 : vector<8x256xf32>
    %16 = arith.truncf %15 : vector<8x256xf32> to vector<8x256xbf16>
    %c0_12 = arith.constant 0 : index
    %c0_13 = arith.constant 0 : index
    %17 = vector.load %arg6[%c0_12, %c0_13] : memref<256x256xbf16, #tpu.memory_space<vmem>>, vector<256x256xbf16>
    %cst_14 = arith.constant dense<0.000000e+00> : vector<8x256xf32>
    %18 = tpu.matmul %16, %17, %cst_14 {dimension_numbers = #tpu.dot_dimension_numbers<[1], [0], [0], [1], [0, 0, 1, 1], [], []>} : vector<8x256xbf16>, vector<256x256xbf16>, vector<8x256xf32> -> vector<8x256xf32>
    %c0_15 = arith.constant 0 : index
    %c0_16 = arith.constant 0 : index
    %19 = vector.load %arg7[%c0_15, %c0_16] : memref<1x256xf32, #tpu.memory_space<vmem>>, vector<1x256xf32>
    %20 = vector.broadcast %19 : vector<1x256xf32> to vector<8x256xf32>
    %21 = arith.addf %18, %20 : vector<8x256xf32>
    %cst_17 = arith.constant 0.000000e+00 : f32
    %22 = vector.broadcast %cst_17 : f32 to vector<8x256xf32>
    %23 = arith.maximumf %21, %22 : vector<8x256xf32>
    %24 = arith.truncf %23 : vector<8x256xf32> to vector<8x256xbf16>
    %c0_18 = arith.constant 0 : index
    %c0_19 = arith.constant 0 : index
    %25 = vector.load %arg8[%c0_18, %c0_19] : memref<256x128xbf16, #tpu.memory_space<vmem>>, vector<256x128xbf16>
    %cst_20 = arith.constant dense<0.000000e+00> : vector<8x128xf32>
    %26 = tpu.matmul %24, %25, %cst_20 {dimension_numbers = #tpu.dot_dimension_numbers<[1], [0], [0], [1], [0, 0, 1, 1], [], []>} : vector<8x256xbf16>, vector<256x128xbf16>, vector<8x128xf32> -> vector<8x128xf32>
    %c0_21 = arith.constant 0 : index
    %c0_22 = arith.constant 0 : index
    %27 = vector.load %arg9[%c0_21, %c0_22] : memref<1x128xf32, #tpu.memory_space<vmem>>, vector<1x128xf32>
    %28 = vector.broadcast %27 : vector<1x128xf32> to vector<8x128xf32>
    %29 = arith.addf %26, %28 : vector<8x128xf32>
    %30 = tpu.iota {dimensions = array<i32: 1>} : vector<8x128xi32>
    %c8_i32 = arith.constant 8 : i32
    %31 = vector.broadcast %c8_i32 : i32 to vector<8x128xi32>
    %32 = arith.cmpi slt, %30, %31 : vector<8x128xi32>
    %33 = math.tanh %29 : vector<8x128xf32>
    %34 = arith.select %32, %33, %29 : vector<8x128xi1>, vector<8x128xf32>
    %c0_23 = arith.constant 0 : index
    %c0_24 = arith.constant 0 : index
    %35 = vector.load %arg10[%c0_23, %c0_24] : memref<8x128xf32, #tpu.memory_space<vmem>>, vector<8x128xf32>
    tpu.vector_store %arg10[%c0_23, %c0_24], %34 {strides = array<i32>} : memref<8x128xf32, #tpu.memory_space<vmem>>, vector<8x128xf32>,
    return
  }
  func.func @transform_0(%arg0: i32) -> (i32, i32) {
    %c0_i32 = arith.constant 0 : i32
    %c0_i32_0 = arith.constant 0 : i32
    return %arg0, %c0_i32 : i32, i32
  }
  func.func @transform_1(%arg0: i32) -> (i32, i32) {
    %c0_i32 = arith.constant 0 : i32
    %c0_i32_0 = arith.constant 0 : i32
    %c0_i32_1 = arith.constant 0 : i32
    return %c0_i32, %c0_i32_0 : i32, i32
  }
  func.func @transform_2(%arg0: i32) -> (i32, i32) {
    %c0_i32 = arith.constant 0 : i32
    %c0_i32_0 = arith.constant 0 : i32
    %c0_i32_1 = arith.constant 0 : i32
    return %c0_i32, %c0_i32_0 : i32, i32
  }
  func.func @transform_3(%arg0: i32) -> (i32, i32) {
    %c0_i32 = arith.constant 0 : i32
    %c0_i32_0 = arith.constant 0 : i32
    %c0_i32_1 = arith.constant 0 : i32
    return %c0_i32, %c0_i32_0 : i32, i32
  }
  func.func @transform_4(%arg0: i32) -> (i32, i32) {
    %c0_i32 = arith.constant 0 : i32
    %c0_i32_0 = arith.constant 0 : i32
    %c0_i32_1 = arith.constant 0 : i32
    return %c0_i32, %c0_i32_0 : i32, i32
  }
  func.func @transform_5(%arg0: i32) -> (i32, i32) {
    %c0_i32 = arith.constant 0 : i32
    %c0_i32_0 = arith.constant 0 : i32
    %c0_i32_1 = arith.constant 0 : i32
    return %c0_i32, %c0_i32_0 : i32, i32
  }
  func.func @transform_6(%arg0: i32) -> (i32, i32) {
    %c0_i32 = arith.constant 0 : i32
    %c0_i32_0 = arith.constant 0 : i32
    %c0_i32_1 = arith.constant 0 : i32
    return %c0_i32, %c0_i32_0 : i32, i32
  }
  func.func @transform_7(%arg0: i32) -> (i32, i32) {
    %c0_i32 = arith.constant 0 : i32
    %c0_i32_0 = arith.constant 0 : i32
    %c0_i32_1 = arith.constant 0 : i32
    return %c0_i32, %c0_i32_0 : i32, i32
  }
  func.func @transform_8(%arg0: i32) -> (i32, i32) {
    %c0_i32 = arith.constant 0 : i32
    %c0_i32_0 = arith.constant 0 : i32
    %c0_i32_1 = arith.constant 0 : i32
    return %c0_i32, %c0_i32_0 : i32, i32
  }
  func.func @transform_9(%arg0: i32) -> (i32, i32) {
    %c0_i32 = arith.constant 0 : i32
    %c0_i32_0 = arith.constant 0 : i32
    return %arg0, %c0_i32 : i32, i32
  }
}

</mosaic_0001>

<bundles_post_ra>
// kernel: policy_network_forward.1
= control target key start
LH: loop header
LB: loop body
LE: loop exit
PB: predicated region body
PF: predicated region fallthrough
CT: control target
= control target key end

     0   :  { %14 = vsyncpa [#allocation3], 0  ;;  %s1448_s0 = inlined_call_operand.vmem [shape: bf16[8,128], index: 0, kind: input, shape index: {}]   ;;  %s1449_s1 = inlined_call_operand.hbm [shape: bf16[128,256], index: 1, kind: input, shape index: {}]   ;;  %s1450_s2 = inlined_call_operand.vmem [shape: f32[1,256], index: 2, kind: input, shape index: {}]   ;;  %s1451_s3 = inlined_call_operand.hbm [shape: bf16[256,256], index: 3, kind: input, shape index: {}]   ;;  %s1452_s4 = inlined_call_operand.vmem [shape: f32[1,256], index: 4, kind: input, shape index: {}]   ;;  %s1453_s5 = inlined_call_operand.hbm [shape: bf16[256,256], index: 5, kind: input, shape index: {}]   ;;  %s1454_s6 = inlined_call_operand.vmem [shape: f32[1,256], index: 6, kind: input, shape index: {}]   ;;  %s1455_s7 = inlined_call_operand.hbm [shape: bf16[256,128], index: 7, kind: input, shape index: {}]   ;;  %s1456_s8 = inlined_call_operand.vmem [shape: f32[1,128], index: 8, kind: input, shape index: {}]   ;;  %s1457_s9 = inlined_call_operand.vmem [shape: f32[8,128], index: 9, kind: output, shape index: {}]  }
   0x1   :  { %15 = vsyncpa [#allocation5], 0 }
   0x2   :  { %16 = vsyncpa [#allocation8], 0  ;;  %s1288_s30 = smov [#allocation4]   ;;  %s1289_s11 = smov [#allocation2]  }
   0x3   :  { %s38_s10 = sshll.u32 %s1288_s30, 4  ;;  %s24_s12 = sshll.u32 %s1289_s11, 4  ;;  %s39_s10 = int_to_ptr.vmem [resolvable:$true] %s38_s10  ;;  %s1347_s12 = int_to_ptr.vmem [resolvable:$true] %s24_s12 }
   0x4   :  { %s1194_s15 = scalar_lea.hbm %s1451_s3, 4096 }
   0x5   :  { %p1195_p0 = scmp.ne.s32.totalorder %s1451_s3, %s1194_s15  ;;  %p1198_p1 = scmp.lt.u32.totalorder %s1194_s15, %s1451_s3 }
   0x7   :  { %p1200_p2 = pnand %p1198_p1, %p1195_p0 }
   0x9   :  { %1203 = shalt.err (!%p1200_p2)
}
   0xa   :  { %s1204_s20 = scalar_lea.vmem %s39_s10, 4096  ;;  %p1209_p4 = scmp.lt.s32.totalorder %s39_s10, %s39_s10 }
   0xb   :  { %p1205_p3 = scmp.ne.s32.totalorder %s39_s10, %s1204_s20  ;;  %p1210_p5 = scmp.lt.s32.totalorder %s1204_s20, %s1204_s20 }
   0xd   :  { %p1211_p6 = por %p1210_p5, %p1209_p4 }
   0xf   :  { %p1212_p7 = pnand %p1211_p6, %p1205_p3 }
  0x11   :  { %1215 = shalt.err (!%p1212_p7)
}
  0x12   :  { %s1290_s21 = smov 128   ;;  %s1291_s22 = smov 8  }
  0x13   :  { %44 = dma.hbm_to_vmem [thread:$0]  %s1451_s3, 4096, %s39_s10, [#allocation5], %s1290_s21, %s1290_s21, %s1291_s22  }
  0x14   :  { %s1216_s27 = scalar_lea.hbm %s1449_s1, 2048 }
  0x15   :  { %p1217_p8 = scmp.ne.s32.totalorder %s1449_s1, %s1216_s27  ;;  %p1220_p9 = scmp.lt.u32.totalorder %s1216_s27, %s1449_s1 }
  0x17   :  { %p1222_p10 = pnand %p1220_p9, %p1217_p8 }
  0x19   :  { %1225 = shalt.err (!%p1222_p10)
}
  0x1a   :  { %s1226_s13 = scalar_lea.vmem %s1347_s12, 2048  ;;  %p1231_p12 = scmp.lt.s32.totalorder %s1347_s12, %s1347_s12 }
  0x1b   :  { %p1227_p11 = scmp.ne.s32.totalorder %s1347_s12, %s1226_s13  ;;  %p1232_p13 = scmp.lt.s32.totalorder %s1226_s13, %s1226_s13 }
  0x1d   :  { %p1233_p0 = por %p1232_p13, %p1231_p12 }
  0x1f   :  { %p1234_p1 = pnand %p1233_p0, %p1227_p11 }
  0x21   :  { %1237 = shalt.err (!%p1234_p1)
}
  0x22   :  { %30 = dma.hbm_to_vmem [thread:$0]  %s1449_s1, 2048, %s1347_s12, [#allocation3], %s1290_s21, %s1290_s21, %s1291_s22  }
  0x23   :  { %s1292_s14 = smov [#allocation6]   ;;  %s1293_s16 = smov [#allocation7]  }
  0x24   :  { %s52_s15 = sshll.u32 %s1292_s14, 4  ;;  %s66_s17 = sshll.u32 %s1293_s16, 4  ;;  %s53_s15 = int_to_ptr.vmem [resolvable:$true] %s52_s15  ;;  %s1384_s17 = int_to_ptr.vmem [resolvable:$true] %s66_s17 }
  0x25   :  { %s1238_s20 = scalar_lea.hbm %s1453_s5, 4096 }
  0x26   :  { %p1239_p2 = scmp.ne.s32.totalorder %s1453_s5, %s1238_s20  ;;  %p1242_p3 = scmp.lt.u32.totalorder %s1238_s20, %s1453_s5 }
  0x28   :  { %p1244_p4 = pnand %p1242_p3, %p1239_p2 }
  0x2a   :  { %1247 = shalt.err (!%p1244_p4)
}
  0x2b   :  { %s1248_s1 = scalar_lea.vmem %s53_s15, 4096  ;;  %p1253_p6 = scmp.lt.s32.totalorder %s53_s15, %s53_s15 }
  0x2c   :  { %p1249_p5 = scmp.ne.s32.totalorder %s53_s15, %s1248_s1  ;;  %p1254_p7 = scmp.lt.s32.totalorder %s1248_s1, %s1248_s1 }
  0x2e   :  { %p1255_p8 = por %p1254_p7, %p1253_p6 }
  0x30   :  { %p1256_p9 = pnand %p1255_p8, %p1249_p5 }
  0x32   :  { %1259 = shalt.err (!%p1256_p9)
}
  0x33   :  { %58 = dma.hbm_to_vmem [thread:$0]  %s1453_s5, 4096, %s53_s15, [#allocation5], %s1290_s21, %s1290_s21, %s1291_s22  }
  0x34   :  { %s1260_s30 = scalar_lea.hbm %s1455_s7, 2048 }
  0x35   :  { %p1261_p10 = scmp.ne.s32.totalorder %s1455_s7, %s1260_s30  ;;  %p1264_p11 = scmp.lt.u32.totalorder %s1260_s30, %s1455_s7 }
  0x37   :  { %p1266_p12 = pnand %p1264_p11, %p1261_p10 }
  0x39   :  { %1269 = shalt.err (!%p1266_p12)
}
  0x3a   :  { %s1270_s14 = scalar_lea.vmem %s1384_s17, 2048  ;;  %p1275_p0 = scmp.lt.s32.totalorder %s1384_s17, %s1384_s17 }
  0x3b   :  { %p1271_p13 = scmp.ne.s32.totalorder %s1384_s17, %s1270_s14  ;;  %p1276_p1 = scmp.lt.s32.totalorder %s1270_s14, %s1270_s14 }
  0x3d   :  { %p1277_p2 = por %p1276_p1, %p1275_p0 }
  0x3f   :  { %p1278_p3 = pnand %p1277_p2, %p1271_p13 }
  0x41   :  { %1281 = shalt.err (!%p1278_p3)
}
  0x42   :  { %s1294_s5 = smov 64   ;;  %s1295_s21 = smov 4  }
  0x43   :  { %72 = dma.hbm_to_vmem [thread:$0]  %s1455_s7, 2048, %s1384_s17, [#allocation8], %s1294_s5, %s1294_s5, %s1295_s21  }
  0x44   :  { %1282 = dma.done.wait [#allocation3], 2048  }
  0x45   :  { %1283 = vsyncadd [#allocation3], 4294965248 }
  0x46   :  { %1284 = dma.done.wait [#allocation5], 8192  }
  0x47   :  { %1285 = vsyncadd [#allocation5], 4294959104 }
  0x48   :  { %1286 = dma.done.wait [#allocation8], 2048  }
  0x49   :  { %1287 = vsyncadd [#allocation8], 4294965248  ;;  %v1296_v0 = vmov 0   ;;  %v1056_v1 = vld [vmem:[#allocation2 + $0x4] ss:$8 sps:$4 sm:$0xff]  }
  0x4a   :  { %229 = vmatprep.mubr.bf16.mxu0 %v1296_v0  ;;  %v1058_v2 = vld [vmem:[#allocation2] ss:$8 sps:$4 sm:$0xff]   ;;  %197 = vmatprep.subr.bf16.mxu0 %v1056_v1  ;;  %v1059_v3 = vld [vmem:[#allocation2 + $0x14] ss:$8 sps:$4 sm:$0xff]   ;;  %v1061_v4 = vld [vmem:[#allocation2 + $0x10] ss:$8 sps:$4 sm:$0xff]  }
  0x4b   :  { %198 = vmatpush1.bf16.msra.mxu0 %v1058_v2  ;;  %v1062_v5 = vld [vmem:[#allocation2 + $0x24] ss:$8 sps:$4 sm:$0xff]   ;;  %v1064_v6 = vld [vmem:[#allocation2 + $0x20] ss:$8 sps:$4 sm:$0xff]   ;;  %v1065_v7 = vld [vmem:[#allocation2 + $0x34] ss:$8 sps:$4 sm:$0xff]  }
  0x4c   :  { %199 = vmatprep.subr.bf16.mxu0 %v1059_v3  ;;  %v1067_v8 = vld [vmem:[#allocation2 + $0x30] ss:$8 sps:$4 sm:$0xff]   ;;  %v1068_v9 = vld [vmem:[#allocation2 + $0x44] ss:$8 sps:$4 sm:$0xff]   ;;  %v1082_v11 = vld [vmem:[#allocation4] ss:$8 sps:$4 sm:$0xff]  }
  0x4d   :  { %v1080_v10 = vld [vmem:[#allocation4 + $0x4] ss:$8 sps:$4 sm:$0xff]   ;;  %v1083_v12 = vld [vmem:[#allocation4 + $0x14] ss:$8 sps:$4 sm:$0xff]   ;;  %v1070_v13 = vld [vmem:[#allocation2 + $0x40] ss:$8 sps:$4 sm:$0xff]  }
  0x4e   :  { %446 = vmatprep.subr.bf16.mxu1 %v1080_v10  ;;  %v1085_v14 = vld [vmem:[#allocation4 + $0x10] ss:$8 sps:$4 sm:$0xff]   ;;  %v1086_v15 = vld [vmem:[#allocation4 + $0x24] ss:$8 sps:$4 sm:$0xff]   ;;  %v1071_v16 = vld [vmem:[#allocation2 + $0x54] ss:$8 sps:$4 sm:$0xff]  }
  0x4f   :  { %200 = vmatpush1.bf16.msra.mxu0 %v1061_v4  ;;  %447 = vmatpush1.bf16.msra.mxu1 %v1082_v11  ;;  %v1073_v17 = vld [vmem:[#allocation2 + $0x50] ss:$8 sps:$4 sm:$0xff]   ;;  %v1088_v18 = vld [vmem:[#allocation4 + $0x20] ss:$8 sps:$4 sm:$0xff]   ;;  %v1089_v19 = vld [vmem:[#allocation4 + $0x34] ss:$8 sps:$4 sm:$0xff]  }
  0x50   :  { %201 = vmatprep.subr.bf16.mxu0 %v1062_v5  ;;  %448 = vmatprep.subr.bf16.mxu1 %v1083_v12  ;;  %v1074_v20 = vld [vmem:[#allocation2 + $0x64] ss:$8 sps:$4 sm:$0xff]   ;;  %v1076_v21 = vld [vmem:[#allocation2 + $0x60] ss:$8 sps:$4 sm:$0xff]   ;;  %v1091_v22 = vld [vmem:[#allocation4 + $0x30] ss:$8 sps:$4 sm:$0xff]  }
  0x51   :  { %v1092_v23 = vld [vmem:[#allocation4 + $0x44] ss:$8 sps:$4 sm:$0xff]   ;;  %v1077_v24 = vld [vmem:[#allocation2 + $0x74] ss:$8 sps:$4 sm:$0xff]   ;;  %v1079_v25 = vld [vmem:[#allocation2 + $0x70] ss:$8 sps:$4 sm:$0xff]  }
  0x52   :  { %v1094_v26 = vld [vmem:[#allocation4 + $0x40] ss:$8 sps:$4 sm:$0xff]   ;;  %v1095_v27 = vld [vmem:[#allocation4 + $0x54] ss:$8 sps:$4 sm:$0xff]   ;;  %v1097_v29 = vld [vmem:[#allocation4 + $0x50] ss:$8 sps:$4 sm:$0xff]  }
  0x53   :  { %202 = vmatpush1.bf16.msra.mxu0 %v1064_v6  ;;  %449 = vmatpush1.bf16.msra.mxu1 %v1085_v14  ;;  %v88_v28 = vld [vmem:[%s1448_s0] sm:$0xf]  ;;  %v1098_v30 = vld [vmem:[#allocation4 + $0x64] ss:$8 sps:$4 sm:$0xff]   ;;  %v1101_v32 = vld [vmem:[#allocation4 + $0x74] ss:$8 sps:$4 sm:$0xff]   ;;  %v107_v14 = vlaneseq }
  0x54   :  { %203 = vmatprep.subr.bf16.mxu0 %v1065_v7  ;;  %450 = vmatprep.subr.bf16.mxu1 %v1086_v15  ;;  %v1100_v31 = vld [vmem:[#allocation4 + $0x60] ss:$8 sps:$4 sm:$0xff]   ;;  %v1103_v33 = vld [vmem:[#allocation4 + $0x70] ss:$8 sps:$4 sm:$0xff]   ;;  %v1104_v34 = vld [vmem:[#allocation4 + $0x84] ss:$8 sps:$4 sm:$0xff]  }
  0x55   :  { %v1106_v35 = vld [vmem:[#allocation4 + $0x80] ss:$8 sps:$4 sm:$0xff]   ;;  %v1107_v36 = vld [vmem:[#allocation4 + $0x94] ss:$8 sps:$4 sm:$0xff]   ;;  %v1109_v37 = vld [vmem:[#allocation4 + $0x90] ss:$8 sps:$4 sm:$0xff]  }
  0x56   :  { %v1110_v38 = vld [vmem:[#allocation4 + $0xa4] ss:$8 sps:$4 sm:$0xff]   ;;  %v1112_v39 = vld [vmem:[#allocation4 + $0xa0] ss:$8 sps:$4 sm:$0xff]   ;;  %v1113_v40 = vld [vmem:[#allocation4 + $0xb4] ss:$8 sps:$4 sm:$0xff]  }
  0x57   :  { %204 = vmatpush1.bf16.msra.mxu0 %v1067_v8  ;;  %451 = vmatpush1.bf16.msra.mxu1 %v1088_v18  ;;  %v1115_v41 = vld [vmem:[#allocation4 + $0xb0] ss:$8 sps:$4 sm:$0xff]   ;;  %v1116_v42 = vld [vmem:[#allocation4 + $0xc4] ss:$8 sps:$4 sm:$0xff]   ;;  %v1118_v43 = vld [vmem:[#allocation4 + $0xc0] ss:$8 sps:$4 sm:$0xff]  }
  0x58   :  { %205 = vmatprep.subr.bf16.mxu0 %v1068_v9  ;;  %452 = vmatprep.subr.bf16.mxu1 %v1089_v19  ;;  %v1119_v44 = vld [vmem:[#allocation4 + $0xd4] ss:$8 sps:$4 sm:$0xff]   ;;  %v1121_v45 = vld [vmem:[#allocation4 + $0xd0] ss:$8 sps:$4 sm:$0xff]   ;;  %v1122_v46 = vld [vmem:[#allocation4 + $0xe4] ss:$8 sps:$4 sm:$0xff]  }
  0x59   :  { %v1124_v47 = vld [vmem:[#allocation4 + $0xe0] ss:$8 sps:$4 sm:$0xff]   ;;  %v1125_v48 = vld [vmem:[#allocation4 + $0xf4] ss:$8 sps:$4 sm:$0xff]   ;;  %v1127_v49 = vld [vmem:[#allocation4 + $0xf0] ss:$8 sps:$4 sm:$0xff]  }
  0x5a   :  { %v1128_v50 = vld [vmem:[#allocation6] ss:$8 sps:$4 sm:$0xff]   ;;  %v1130_v51 = vld [vmem:[#allocation6 + $0x4] ss:$8 sps:$4 sm:$0xff]   ;;  %v1133_v52 = vld [vmem:[#allocation6 + $0x14] ss:$8 sps:$4 sm:$0xff]  }
  0x5b   :  { %206 = vmatpush1.bf16.msra.mxu0 %v1070_v13  ;;  %453 = vmatpush1.bf16.msra.mxu1 %v1091_v22  ;;  %v1131_v53 = vld [vmem:[#allocation6 + $0x10] ss:$8 sps:$4 sm:$0xff]   ;;  %v1136_v54 = vld [vmem:[#allocation6 + $0x24] ss:$8 sps:$4 sm:$0xff]   ;;  %v1134_v55 = vld [vmem:[#allocation6 + $0x20] ss:$8 sps:$4 sm:$0xff]  }
  0x5c   :  { %207 = vmatprep.subr.bf16.mxu0 %v1071_v16  ;;  %454 = vmatprep.subr.bf16.mxu1 %v1092_v23  ;;  %v1139_v56 = vld [vmem:[#allocation6 + $0x34] ss:$8 sps:$4 sm:$0xff]   ;;  %v1137_v57 = vld [vmem:[#allocation6 + $0x30] ss:$8 sps:$4 sm:$0xff]   ;;  %v1142_v58 = vld [vmem:[#allocation6 + $0x44] ss:$8 sps:$4 sm:$0xff]  }
  0x5d   :  { %v1140_v59 = vld [vmem:[#allocation6 + $0x40] ss:$8 sps:$4 sm:$0xff]   ;;  %v1145_v60 = vld [vmem:[#allocation6 + $0x54] ss:$8 sps:$4 sm:$0xff]   ;;  %v1143_v61 = vld [vmem:[#allocation6 + $0x50] ss:$8 sps:$4 sm:$0xff]  }
  0x5e   :  { %v1148_v62 = vld [vmem:[#allocation6 + $0x64] ss:$8 sps:$4 sm:$0xff]   ;;  %v1146_v63 = vld [vmem:[#allocation6 + $0x60] ss:$8 sps:$4 sm:$0xff]   ;;  %v1151_v0 = vld [vmem:[#allocation6 + $0x74] ss:$8 sps:$4 sm:$0xff]  }
  0x5f   :  { %208 = vmatpush1.bf16.msra.mxu0 %v1073_v17  ;;  %455 = vmatpush1.bf16.msra.mxu1 %v1094_v26  ;;  %v1149_v1 = vld [vmem:[#allocation6 + $0x70] ss:$8 sps:$4 sm:$0xff]   ;;  %v1154_v2 = vld [vmem:[#allocation6 + $0x84] ss:$8 sps:$4 sm:$0xff]   ;;  %v1152_v3 = vld [vmem:[#allocation6 + $0x80] ss:$8 sps:$4 sm:$0xff]  }
  0x60   :  { %209 = vmatprep.subr.bf16.mxu0 %v1074_v20  ;;  %456 = vmatprep.subr.bf16.mxu1 %v1095_v27  ;;  %v1157_v4 = vld [vmem:[#allocation6 + $0x94] ss:$8 sps:$4 sm:$0xff]   ;;  %v1155_v5 = vld [vmem:[#allocation6 + $0x90] ss:$8 sps:$4 sm:$0xff]   ;;  %v1160_v6 = vld [vmem:[#allocation6 + $0xa4] ss:$8 sps:$4 sm:$0xff]  }
  0x61   :  { %v1158_v7 = vld [vmem:[#allocation6 + $0xa0] ss:$8 sps:$4 sm:$0xff]   ;;  %v1163_v8 = vld [vmem:[#allocation6 + $0xb4] ss:$8 sps:$4 sm:$0xff]   ;;  %v1161_v9 = vld [vmem:[#allocation6 + $0xb0] ss:$8 sps:$4 sm:$0xff]  }
  0x62   :  { %v1166_v10 = vld [vmem:[#allocation6 + $0xc4] ss:$8 sps:$4 sm:$0xff]   ;;  %v1164_v11 = vld [vmem:[#allocation6 + $0xc0] ss:$8 sps:$4 sm:$0xff]   ;;  %v1169_v12 = vld [vmem:[#allocation6 + $0xd4] ss:$8 sps:$4 sm:$0xff]  }
  0x63   :  { %210 = vmatpush1.bf16.msra.mxu0 %v1076_v21  ;;  %457 = vmatpush1.bf16.msra.mxu1 %v1097_v29  ;;  %v1167_v13 = vld [vmem:[#allocation6 + $0xd0] ss:$8 sps:$4 sm:$0xff]   ;;  %v108_v15 = vshrl.u32 %v107_v14, 7  ;;  %v105_v17 = vld [vmem:[%s1450_s2] sm:$0x3] }
  0x64   :  { %211 = vmatprep.subr.bf16.mxu0 %v1077_v24  ;;  %458 = vmatprep.subr.bf16.mxu1 %v1098_v30 }
  0x65   :  { %v1422_v16 = vsub.s32 0, %v108_v15  ;;  %v1427_v18 = vsub.s32 1, %v108_v15  ;;  %v1008_v15 = vld [vmem:[%s1456_s8] ss:$0 sm:$0xff] }
  0x67   :  { %212 = vmatpush1.bf16.msra.mxu0 %v1079_v25  ;;  %459 = vmatpush1.bf16.msra.mxu1 %v1100_v31  ;;  %v110_v19 = vrot.slane %v105_v17, %v1422_v16  ;;  %v114_v20 = vrot.slane %v105_v17, %v1427_v18  ;;  %v1172_v31 = vld [vmem:[#allocation6 + $0xe4] ss:$8 sps:$4 sm:$0xff]  }
  0x68   :  { %460 = vmatprep.subr.bf16.mxu1 %v1101_v32  ;;  %695 = vmatprep.subr.bf16.mxu0 %v1130_v51  ;;  %v1170_v32 = vld [vmem:[#allocation6 + $0xe0] ss:$8 sps:$4 sm:$0xff]  }
  0x6a   :  { %230 = vmatmul.mubr.bf16.vlgmr.msra.gmra.mrb[0].mxu0 %v88_v28 }
  0x6b   :  { %461 = vmatpush1.bf16.msra.mxu1 %v1103_v33  ;;  %696 = vmatpush1.bf16.msra.mxu0 %v1128_v50  ;;  %v1175_v33 = vld [vmem:[#allocation6 + $0xf4] ss:$8 sps:$4 sm:$0xff]  }
  0x6c   :  { %462 = vmatprep.subr.bf16.mxu1 %v1104_v34  ;;  %697 = vmatprep.subr.bf16.mxu0 %v1133_v52  ;;  %v1173_v34 = vld [vmem:[#allocation6 + $0xf0] ss:$8 sps:$4 sm:$0xff]  }
  0x6f   :  { %463 = vmatpush1.bf16.msra.mxu1 %v1106_v35  ;;  %698 = vmatpush1.bf16.msra.mxu0 %v1131_v53  ;;  %v1176_v35 = vld [vmem:[#allocation7 + $0x40] sm:$0xff]  }
  0x70   :  { %464 = vmatprep.subr.bf16.mxu1 %v1107_v36  ;;  %699 = vmatprep.subr.bf16.mxu0 %v1136_v54  ;;  %v1177_v36 = vld [vmem:[#allocation7] sm:$0xff]  }
  0x73   :  { %465 = vmatpush1.bf16.msra.mxu1 %v1109_v37  ;;  %700 = vmatpush1.bf16.msra.mxu0 %v1134_v55  ;;  %v1178_v37 = vld [vmem:[#allocation7 + $0x48] sm:$0xff]  }
  0x74   :  { %466 = vmatprep.subr.bf16.mxu1 %v1110_v38  ;;  %701 = vmatprep.subr.bf16.mxu0 %v1139_v56  ;;  %v1179_v38 = vld [vmem:[#allocation7 + $0x8] sm:$0xff]  }
  0x77   :  { %467 = vmatpush1.bf16.msra.mxu1 %v1112_v39  ;;  %702 = vmatpush1.bf16.msra.mxu0 %v1137_v57  ;;  %v1180_v39 = vld [vmem:[#allocation7 + $0x50] sm:$0xff]  }
  0x78   :  { %468 = vmatprep.subr.bf16.mxu1 %v1113_v40  ;;  %703 = vmatprep.subr.bf16.mxu0 %v1142_v58  ;;  %v1181_v40 = vld [vmem:[#allocation7 + $0x10] sm:$0xff]  }
  0x7b   :  { %469 = vmatpush1.bf16.msra.mxu1 %v1115_v41  ;;  %704 = vmatpush1.bf16.msra.mxu0 %v1140_v59  ;;  %v1182_v41 = vld [vmem:[#allocation7 + $0x58] sm:$0xff]  }
  0x7c   :  { %470 = vmatprep.subr.bf16.mxu1 %v1116_v42  ;;  %705 = vmatprep.subr.bf16.mxu0 %v1145_v60  ;;  %v1183_v42 = vld [vmem:[#allocation7 + $0x18] sm:$0xff]   ;;  %v1188_v60 = vld [vmem:[#allocation7 + $0x70] sm:$0xff]  }
  0x7f   :  { %471 = vmatpush1.bf16.msra.mxu1 %v1118_v43  ;;  %706 = vmatpush1.bf16.msra.mxu0 %v1143_v61  ;;  %v1184_v43 = vld [vmem:[#allocation7 + $0x60] sm:$0xff]   ;;  %v1189_v61 = vld [vmem:[#allocation7 + $0x30] sm:$0xff]  }
  0x80   :  { %472 = vmatprep.subr.bf16.mxu1 %v1119_v44  ;;  %707 = vmatprep.subr.bf16.mxu0 %v1148_v62  ;;  %v1185_v44 = vld [vmem:[#allocation7 + $0x20] sm:$0xff]   ;;  %v1190_v62 = vld [vmem:[#allocation7 + $0x78] sm:$0xff]  }
  0x83   :  { %473 = vmatpush1.bf16.msra.mxu1 %v1121_v45  ;;  %708 = vmatpush1.bf16.msra.mxu0 %v1146_v63  ;;  %v1186_v45 = vld [vmem:[#allocation7 + $0x68] sm:$0xff]   ;;  %v1191_v63 = vld [vmem:[#allocation7 + $0x38] sm:$0xff]  }
  0x84   :  { %474 = vmatprep.subr.bf16.mxu1 %v1122_v46  ;;  %709 = vmatprep.subr.bf16.mxu0 %v1151_v0  ;;  %v1187_v46 = vld [vmem:[#allocation7 + $0x28] sm:$0xff]   ;;  %v523_v0 = vld [vmem:[%s1454_s6] sm:$0x3] }
  0x87   :  { %475 = vmatpush1.bf16.msra.mxu1 %v1124_v47  ;;  %710 = vmatpush1.bf16.msra.mxu0 %v1149_v1  ;;  %v274_v47 = vld [vmem:[%s1452_s4] sm:$0x3]  ;;  %v528_v1 = vrot.slane %v523_v0, %v1422_v16 }
  0x88   :  { %476 = vmatprep.subr.bf16.mxu1 %v1125_v48  ;;  %711 = vmatprep.subr.bf16.mxu0 %v1154_v2  ;;  %v279_v48 = vrot.slane %v274_v47, %v1422_v16  ;;  %v532_v2 = vrot.slane %v523_v0, %v1427_v18 }
  0x8b   :  { %477 = vmatpush1.bf16.msra.mxu1 %v1127_v49  ;;  %712 = vmatpush1.bf16.msra.mxu0 %v1152_v3  ;;  %v283_v49 = vrot.slane %v274_v47, %v1427_v18 }
  0x8c   :  { %713 = vmatprep.subr.bf16.mxu0 %v1157_v4  ;;  %1025 = vmatprep.subr.bf16.mxu1 %v1176_v35 }
  0x8f   :  { %714 = vmatpush1.bf16.msra.mxu0 %v1155_v5 }
  0x90   :  { %715 = vmatprep.subr.bf16.mxu0 %v1160_v6 }
  0x93   :  { %716 = vmatpush1.bf16.msra.mxu0 %v1158_v7 }
  0x94   :  { %717 = vmatprep.subr.bf16.mxu0 %v1163_v8 }
  0x97   :  { %718 = vmatpush1.bf16.msra.mxu0 %v1161_v9 }
  0x98   :  { %719 = vmatprep.subr.bf16.mxu0 %v1166_v10 }
  0x9b   :  { %720 = vmatpush1.bf16.msra.mxu0 %v1164_v11 }
  0x9c   :  { %721 = vmatprep.subr.bf16.mxu0 %v1169_v12 }
  0x9f   :  { %722 = vmatpush1.bf16.msra.mxu0 %v1167_v13 }
  0xa0   :  { %723 = vmatprep.subr.bf16.mxu0 %v1172_v31 }
  0xa3   :  { %724 = vmatpush1.bf16.msra.mxu0 %v1170_v32 }
  0xa4   :  { %725 = vmatprep.subr.bf16.mxu0 %v1175_v33 }
  0xa7   :  { %726 = vmatpush1.bf16.msra.mxu0 %v1173_v34 }
 0x13d   :  { %v231_v21 = vpop.f32.mrb[0].mxu0 }
 0x13e   :  { %v232_v22 = vadd.f32 %v231_v21, %v110_v19  ;;  %v233_v23 = vpop.f32.mrb[1].mxu0  ;;  %v916_v21 = vand.u32 127, %v107_v14 }
 0x13f   :  { %v234_v24 = vadd.f32 %v233_v23, %v114_v20  ;;  %v235_v25 = vpop.f32.mrb[2].mxu0 }
 0x140   :  { %v238_v26 = vmax.f32 %v232_v22, 0.0  ;;  %v236_v27 = vpop.f32.mrb[3].mxu0  ;;  %vm917_vm0 = vcmp.lt.s32.totalorder %v916_v21, 8 }
 0x141   :  { %v239_v28 = vmax.f32 %v234_v24, 0.0 }
 0x142   :  { %v240_v30 = vpack.c.bf16 %v238_v26, %v238_v26 }
 0x143   :  { %v241_v29 = vpack.c.bf16 %v239_v28, %v239_v28 }
 0x145   :  { %478 = vmatprep.mubr.bf16.mxu1 %v241_v29 }
 0x146   :  { %479 = vmatmul.mubr.bf16.vlgmr.msra.gmra.mrb[0].mxu1 %v240_v30 }
 0x147   :  { %1026 = vmatpush3.bf16.msra.mxu1 %v1177_v36 }
 0x148   :  { %1027 = vmatprep.subr.bf16.mxu1 %v1178_v37 }
 0x14b   :  { %1028 = vmatpush3.bf16.msra.mxu1 %v1179_v38 }
 0x14c   :  { %1029 = vmatprep.subr.bf16.mxu1 %v1180_v39 }
 0x14f   :  { %1030 = vmatpush3.bf16.msra.mxu1 %v1181_v40 }
 0x150   :  { %1031 = vmatprep.subr.bf16.mxu1 %v1182_v41 }
 0x153   :  { %1032 = vmatpush3.bf16.msra.mxu1 %v1183_v42 }
 0x154   :  { %1033 = vmatprep.subr.bf16.mxu1 %v1184_v43 }
 0x157   :  { %1034 = vmatpush3.bf16.msra.mxu1 %v1185_v44 }
 0x158   :  { %1035 = vmatprep.subr.bf16.mxu1 %v1186_v45 }
 0x15b   :  { %1036 = vmatpush3.bf16.msra.mxu1 %v1187_v46 }
 0x15c   :  { %1037 = vmatprep.subr.bf16.mxu1 %v1188_v60 }
 0x15f   :  { %1038 = vmatpush3.bf16.msra.mxu1 %v1189_v61 }
 0x160   :  { %1039 = vmatprep.subr.bf16.mxu1 %v1190_v62 }
 0x163   :  { %1040 = vmatpush3.bf16.msra.mxu1 %v1191_v63 }
 0x219   :  { %v480_v50 = vpop.f32.mrb[0].mxu1 }
 0x21a   :  { %v481_v51 = vadd.f32 %v480_v50, %v279_v48  ;;  %v482_v52 = vpop.f32.mrb[1].mxu1 }
 0x21b   :  { %v483_v53 = vadd.f32 %v482_v52, %v283_v49  ;;  %v484_v54 = vpop.f32.mrb[2].mxu1 }
 0x21c   :  { %v487_v55 = vmax.f32 %v481_v51, 0.0  ;;  %v485_v56 = vpop.f32.mrb[3].mxu1 }
 0x21d   :  { %v488_v57 = vmax.f32 %v483_v53, 0.0 }
 0x21e   :  { %v489_v59 = vpack.c.bf16 %v487_v55, %v487_v55 }
 0x21f   :  { %v490_v58 = vpack.c.bf16 %v488_v57, %v488_v57 }
 0x221   :  { %727 = vmatprep.mubr.bf16.mxu0 %v490_v58 }
 0x222   :  { %728 = vmatmul.mubr.bf16.vlgmr.msra.gmra.mrb[4].mxu0 %v489_v59 }
 0x2f5   :  { %v729_v3 = vpop.f32.mrb[4].mxu0 }
 0x2f6   :  { %v730_v4 = vadd.f32 %v729_v3, %v528_v1  ;;  %v731_v5 = vpop.f32.mrb[5].mxu0 }
 0x2f7   :  { %v732_v6 = vadd.f32 %v731_v5, %v532_v2  ;;  %v733_v7 = vpop.f32.mrb[6].mxu0 }
 0x2f8   :  { %v736_v8 = vmax.f32 %v730_v4, 0.0  ;;  %v734_v9 = vpop.f32.mrb[7].mxu0 }
 0x2f9   :  { %v737_v10 = vmax.f32 %v732_v6, 0.0 }
 0x2fa   :  { %v738_v12 = vpack.c.bf16 %v736_v8, %v736_v8 }
 0x2fb   :  { %v739_v11 = vpack.c.bf16 %v737_v10, %v737_v10 }
 0x2fd   :  { %907 = vmatprep.mubr.bf16.mxu1 %v739_v11 }
 0x2fe   :  { %908 = vmatmul.mubr.bf16.vlgmr.msra.gmra.mrb[4].mxu1 %v738_v12 }
 0x3d1   :  { %v1041_v13 = vpop.f32.mrb[4].mxu1 }
 0x3d2   :  { %v1042_v16 = vpop.f32.mrb[5].mxu1 }
 0x3d3   :  { %v1043_v17 = vadd.f32 %v1042_v16, %v1041_v13  ;;  %v1044_v18 = vpop.f32.mrb[6].mxu1 }
 0x3d4   :  { %v1045_v19 = vpop.f32.mrb[7].mxu1 }
 0x3d5   :  { %v910_v20 = vadd.f32 %v1043_v17, %v1008_v15 }
 0x3d7   :  { %1192 = vtanh.f32 %v910_v20 }
 0x3e1   :  { %v1193_v22 = vpop.eup %1192 }
 0x3e2   :  { %v919_v23 = vsel %vm917_vm0, %v1193_v22, %v910_v20 }
 0x3e3   :  { %920 = vst [vmem:[%s1457_s9] sm:$0xff] %v919_v23 }
 0x3e4   :  { %925 = vsyncpa [#allocation3], 1 }
 0x3e5   :  { %926 = vsyncpa [#allocation5], 1 }
 0x3e6   :  { %927 = vsyncpa [#allocation8], 1 }

</bundles_post_ra>
